<compile_context>
chip_gen: v6e
topology: v6e:2x2x1
jax: 0.10.0
libtpu: 0.0.40
codegen_flags: <defaults>
</compile_context>

<pallas_src>
import functools

import jax
import jax.numpy as jnp
import numpy as np
from jax.experimental import pallas as pl
from jax.experimental.pallas import tpu as pltpu


def _round_up(x, m):
    return (x + m - 1) // m * m


def _block_kernel(x_ref, w1_ref, w2_ref, b1_ref, b2_ref, out_ref,
                  xs_ref, hs_ref, *, H, W, F):
    """Processes nb = x_ref.shape[0] images per grid step.

    x_ref  : (nb, Cin, H*W)   raw f32 input, spatial flattened densely
    w1_ref : (Cout, 9*Cin)    BN1-folded conv1 weights, index (kh*3+kw)*Cin + c
    w2_ref : (Cout, 9*Cout)   BN2-folded conv2 weights
    b*_ref : (Cout, 1)        folded biases (f32)
    out_ref: (nb, Cout, H*W)  dense f32 output (no strip needed in the wrapper)
    xs_ref : (Cin,  XL)       VMEM scratch: H-padded flat input  (compute dtype)
    hs_ref : (Cout, XL)       VMEM scratch: H-padded flat hidden (compute dtype)

    Scratch flat layout: [F zero lanes][top pad row W][H*W image][bottom pad +
    tail zeros].  F makes the image region start 128-lane aligned and absorbs
    the -1 lane offset of the (kh=0,kw=0) tap.  Tap (kh,kw) is the contiguous
    lane slice starting at F + kh*W + kw - 1; kw=0 / kw=2 column wrap-around is
    masked out, so conv output positions map 1:1 to dense H*W lanes.
    """
    nb, Cin, HW = x_ref.shape
    Cout = out_ref.shape[1]
    XL = xs_ref.shape[1]
    cdt = xs_ref.dtype
    base = F + W                       # 128-aligned start of the image region

    # column-wrap masks, computed once per grid step and reused by every image
    col = jax.lax.broadcasted_iota(jnp.int32, (1, HW), 1) % W
    not_left = col != 0                # kw=0 tap is invalid at output col 0
    not_right = col != (W - 1)         # kw=2 tap is invalid at output col W-1

    # Zero only the thin border strips (interior is fully overwritten per image).
    # Done every step so correctness is independent of core sharding of the grid.
    xs_ref[:, 0:base] = jnp.zeros((Cin, base), cdt)
    xs_ref[:, base + HW:XL] = jnp.zeros((Cin, XL - base - HW), cdt)
    hs_ref[:, 0:base] = jnp.zeros((Cout, base), cdt)
    hs_ref[:, base + HW:XL] = jnp.zeros((Cout, XL - base - HW), cdt)

    def conv3x3(src_ref, w_ref):
        # Single K=9*C GEMM: assemble the (9*C, H*W) im2col patch from 9
        # contiguous lane slices of the padded flat activation (one per tap).
        pieces = []
        for kh in range(3):
            for kw in range(3):
                s = src_ref[:, pl.ds(F + kh * W + kw - 1, HW)]
                if kw == 0:
                    s = jnp.where(not_left, s, jnp.zeros_like(s))
                elif kw == 2:
                    s = jnp.where(not_right, s, jnp.zeros_like(s))
                pieces.append(s)
        patch = jnp.concatenate(pieces, axis=0)              # (9*C, H*W)
        return jnp.dot(w_ref[...], patch, preferred_element_type=jnp.float32)

    for i in range(nb):                # unrolled: weight vregs stay resident
        x_i = x_ref[i]                                       # (Cin, H*W) f32
        xs_ref[:, pl.ds(base, HW)] = x_i.astype(cdt)         # aligned, lane-dense

        # conv1 + folded bn1 + relu  (elementwise math kept in f32)
        h = jnp.maximum(conv3x3(xs_ref, w1_ref) + b1_ref[...], 0.0)
        hs_ref[:, pl.ds(base, HW)] = h.astype(cdt)

        # conv2 + folded bn2 + residual (f32 identity from the raw input) + relu
        y = conv3x3(hs_ref, w2_ref) + b2_ref[...] + x_i.astype(jnp.float32)
        out_ref[i] = jnp.maximum(y, 0.0).astype(out_ref.dtype)


def _pick_images_per_step(N, min_steps=4):
    """Largest divisor nb of N keeping >= min_steps grid steps (>=2 per TC on v7x)."""
    best = 1
    for nb in range(1, N + 1):
        if N % nb == 0 and N // nb >= min_steps:
            best = nb
    return best


@functools.partial(jax.jit, static_argnames=("compute_dtype",))
def resnet_block_forward(x_nchw, params, compute_dtype=jnp.bfloat16):
    """ResNet basic-block forward. x_nchw: (N, C, H, W) float32 -> (N, C, H, W) float32."""
    eps = 1e-5
    N, Cin, H, W = x_nchw.shape
    Cout = params["w1"].shape[0]
    assert Cin == Cout, "no downsample path -> in_channel must equal out_channel"
    HW = H * W

    # ---- fold eval-mode BN into conv weights / bias, reorder weights ----
    s1 = params["bn1_gamma"] * jax.lax.rsqrt(params["bn1_var"] + eps)
    b1 = (params["b1"] - params["bn1_mean"]) * s1 + params["bn1_beta"]
    s2 = params["bn2_gamma"] * jax.lax.rsqrt(params["bn2_var"] + eps)
    b2 = (params["b2"] - params["bn2_mean"]) * s2 + params["bn2_beta"]
    w1 = params["w1"] * s1[:, None, None, None]              # (Cout, Cin, 3, 3)
    w2 = params["w2"] * s2[:, None, None, None]
    # w_m[cout, (kh*3+kw)*C + c] = w[cout, c, kh, kw]
    w1m = jnp.transpose(w1, (0, 2, 3, 1)).reshape(Cout, 9 * Cin).astype(compute_dtype)
    w2m = jnp.transpose(w2, (0, 2, 3, 1)).reshape(Cout, 9 * Cout).astype(compute_dtype)
    b1c = b1.astype(jnp.float32).reshape(Cout, 1)
    b2c = b2.astype(jnp.float32).reshape(Cout, 1)

    # free metadata reshape only: NO pad / cast / transpose HBM passes on x.
    x_flat = x_nchw.reshape(N, Cin, HW)

    # scratch layout constants: image region starts 128-lane aligned; the front
    # pad absorbs the -1 offset of the (0,0) tap; the tail covers bottom-row reads.
    F = ((-W) % 128) or 128
    XL = _round_up(F + HW + 2 * W + 1, 128)

    nb = _pick_images_per_step(N)      # >= 2 grid steps per TC when N allows
    itemsize = jnp.dtype(compute_dtype).itemsize
    vmem_bytes = (2 * (nb * Cin * HW * 4 + nb * Cout * HW * 4)       # dbl-buffered io
                  + 2 * (Cout * 9 * Cin + Cout * 9 * Cout) * itemsize + 8 * Cout
                  + (Cin + Cout) * XL * itemsize)
    vmem_limit = int(min(64 * 1024 * 1024, max(4 * 1024 * 1024, 2 * vmem_bytes)))

    out_flat = pl.pallas_call(
        functools.partial(_block_kernel, H=H, W=W, F=F),
        out_shape=jax.ShapeDtypeStruct((N, Cout, HW), jnp.float32),
        grid=(N // nb,),
        in_specs=[
            pl.BlockSpec((nb, Cin, HW), lambda n: (n, 0, 0)),
            pl.BlockSpec((Cout, 9 * Cin), lambda n: (0, 0)),
            pl.BlockSpec((Cout, 9 * Cout), lambda n: (0, 0)),
            pl.BlockSpec((Cout, 1), lambda n: (0, 0)),
            pl.BlockSpec((Cout, 1), lambda n: (0, 0)),
        ],
        out_specs=pl.BlockSpec((nb, Cout, HW), lambda n: (n, 0, 0)),
        scratch_shapes=[pltpu.VMEM((Cin, XL), compute_dtype),
                        pltpu.VMEM((Cout, XL), compute_dtype)],
        compiler_params=pltpu.CompilerParams(
            dimension_semantics=("parallel",),
            vmem_limit_bytes=vmem_limit),
    )(x_flat, w1m, w2m, b1c, b2c)

    # free metadata reshape back to NCHW -- no strip pass needed.
    return out_flat.reshape(N, Cout, H, W)


def _reference_forward(x_nchw, params):
    """Pure-JAX reference (lax conv) for a correctness check."""
    eps = 1e-5

    def conv(x, w, b):
        y = jax.lax.conv_general_dilated(
            x, w, window_strides=(1, 1), padding=((1, 1), (1, 1)),
            dimension_numbers=("NCHW", "OIHW", "NCHW"))
        return y + b[None, :, None, None]

    def bn(x, g, beta, m, v):
        return (x - m[None, :, None, None]) / jnp.sqrt(v[None, :, None, None] + eps) \
            * g[None, :, None, None] + beta[None, :, None, None]

    identity = x_nchw
    h = jax.nn.relu(bn(conv(x_nchw, params["w1"], params["b1"]),
                       params["bn1_gamma"], params["bn1_beta"],
                       params["bn1_mean"], params["bn1_var"]))
    h = bn(conv(h, params["w2"], params["b2"]),
           params["bn2_gamma"], params["bn2_beta"],
           params["bn2_mean"], params["bn2_var"])
    return jax.nn.relu(h + identity)


def init_params(key, in_channel, out_channel):
    ks = jax.random.split(key, 8)
    scale = 0.1
    return {
        "w1": scale * jax.random.normal(ks[0], (out_channel, in_channel, 3, 3), jnp.float32),
        "b1": scale * jax.random.normal(ks[1], (out_channel,), jnp.float32),
        "w2": scale * jax.random.normal(ks[2], (out_channel, out_channel, 3, 3), jnp.float32),
        "b2": scale * jax.random.normal(ks[3], (out_channel,), jnp.float32),
        "bn1_gamma": 1.0 + 0.1 * jax.random.normal(ks[4], (out_channel,), jnp.float32),
        "bn1_beta": 0.1 * jax.random.normal(ks[5], (out_channel,), jnp.float32),
        "bn1_mean": jnp.zeros((out_channel,), jnp.float32),   # fresh running stats
        "bn1_var": jnp.ones((out_channel,), jnp.float32),
        "bn2_gamma": 1.0 + 0.1 * jax.random.normal(ks[6], (out_channel,), jnp.float32),
        "bn2_beta": 0.1 * jax.random.normal(ks[7], (out_channel,), jnp.float32),
        "bn2_mean": jnp.zeros((out_channel,), jnp.float32),
        "bn2_var": jnp.ones((out_channel,), jnp.float32),
    }


if __name__ == "__main__":
    key = jax.random.PRNGKey(0)
    k_x, k_p = jax.random.split(key)

    # in_channel == out_channel (no downsample path); N=8 gives nb=2 per step
    # and 4 grid steps (>= 2 per TensorCore on v7x).
    N, C, H, W = 8, 8, 16, 16
    x = jax.random.normal(k_x, (N, C, H, W), jnp.float32)
    params = init_params(k_p, C, C)

    ref = jax.block_until_ready(_reference_forward(x, params))

    # exact f32 path: tight tolerance against the lax reference
    out_f32 = jax.block_until_ready(
        resnet_block_forward(x, params, compute_dtype=jnp.float32))
    np.testing.assert_allclose(np.asarray(out_f32), np.asarray(ref),
                               rtol=1e-4, atol=1e-4)

    # default bf16-MXU / f32-accumulation path: relaxed tolerance
    out_bf16 = jax.block_until_ready(resnet_block_forward(x, params))
    np.testing.assert_allclose(np.asarray(out_bf16), np.asarray(ref),
                               rtol=5e-2, atol=5e-2)

    print("KERNEL_OK")
</pallas_src>

<mosaic_0001>
module attributes {stable_mosaic.version = 11 : i64} {
  func.func @_block_kernel(%arg0: i32, %arg1: memref<2x8x256xf32, #tpu.memory_space<vmem>>, %arg2: memref<8x72xf32, #tpu.memory_space<vmem>>, %arg3: memref<8x72xf32, #tpu.memory_space<vmem>>, %arg4: memref<8x1xf32, #tpu.memory_space<vmem>>, %arg5: memref<8x1xf32, #tpu.memory_space<vmem>>, %arg6: memref<2x8x256xf32, #tpu.memory_space<vmem>>, %arg7: memref<8x512xf32, #tpu.memory_space<vmem>>, %arg8: memref<8x512xf32, #tpu.memory_space<vmem>>) attributes {dimension_semantics = [#tpu.dimension_semantics<parallel>], iteration_bounds = array<i64: 4>, scalar_prefetch = 0 : i64, scratch_operands = 2 : i64, tpu.core_type = #tpu.core_type<tc>, window_params = [{transform_indices = @transform_0, window_bounds = array<i64: 2, 8, 256>}, {pipeline_mode = #tpu.pipeline_mode<synchronous>, transform_indices = @transform_1, window_bounds = array<i64: 8, 72>}, {pipeline_mode = #tpu.pipeline_mode<synchronous>, transform_indices = @transform_2, window_bounds = array<i64: 8, 72>}, {pipeline_mode = #tpu.pipeline_mode<synchronous>, transform_indices = @transform_3, window_bounds = array<i64: 8, 1>}, {pipeline_mode = #tpu.pipeline_mode<synchronous>, transform_indices = @transform_4, window_bounds = array<i64: 8, 1>}, {transform_indices = @transform_5, window_bounds = array<i64: 2, 8, 256>}]} {
    %0 = tpu.iota {dimensions = array<i32: 1>} : vector<1x256xi32>
    %c16_i32 = arith.constant 16 : i32
    %c0_i32 = arith.constant 0 : i32
    %1 = arith.cmpi eq, %c16_i32, %c0_i32 : i32
    %c1_i32 = arith.constant 1 : i32
    %2 = arith.select %1, %c1_i32, %c16_i32 : i32
    %3 = vector.broadcast %2 : i32 to vector<1x256xi32>
    %4 = arith.remsi %0, %3 : vector<1x256xi32>
    %c0_i32_0 = arith.constant 0 : i32
    %5 = vector.broadcast %c0_i32_0 : i32 to vector<1x256xi32>
    %6 = arith.cmpi ne, %4, %5 : vector<1x256xi32>
    %c0_i32_1 = arith.constant 0 : i32
    %7 = vector.broadcast %c0_i32_1 : i32 to vector<1x256xi32>
    %8 = arith.cmpi slt, %4, %7 : vector<1x256xi32>
    %c0_i32_2 = arith.constant 0 : i32
    %9 = arith.cmpi slt, %2, %c0_i32_2 : i32
    %10 = vector.broadcast %9 : i1 to vector<1x256xi1>
    %11 = vector.broadcast %10 : vector<1x256xi1> to vector<1x256xi1>
    %12 = arith.xori %8, %11 : vector<1x256xi1>
    %13 = arith.andi %12, %6 : vector<1x256xi1>
    %14 = vector.broadcast %2 : i32 to vector<1x256xi32>
    %15 = arith.addi %4, %14 : vector<1x256xi32>
    %16 = arith.select %13, %15, %4 : vector<1x256xi1>, vector<1x256xi32>
    %c0_i32_3 = arith.constant 0 : i32
    %17 = vector.broadcast %c0_i32_3 : i32 to vector<1x256xi32>
    %18 = arith.cmpi ne, %16, %17 : vector<1x256xi32>
    %c15_i32 = arith.constant 15 : i32
    %19 = vector.broadcast %c15_i32 : i32 to vector<1x256xi32>
    %20 = arith.cmpi ne, %16, %19 : vector<1x256xi32>
    %cst = arith.constant 0.000000e+00 : f32
    %21 = vector.broadcast %cst : f32 to vector<8x128xf32>
    %c0 = arith.constant 0 : index
    %c0_4 = arith.constant 0 : index
    %22 = vector.load %arg7[%c0, %c0_4] : memref<8x512xf32, #tpu.memory_space<vmem>>, vector<8x128xf32>
    tpu.vector_store %arg7[%c0, %c0_4], %21 {strides = array<i32>} : memref<8x512xf32, #tpu.memory_space<vmem>>, vector<8x128xf32>,
    %cst_5 = arith.constant 0.000000e+00 : f32
    %23 = vector.broadcast %cst_5 : f32 to vector<8x128xf32>
    %c0_6 = arith.constant 0 : index
    %c384 = arith.constant 384 : index
    %24 = vector.load %arg7[%c0_6, %c384] : memref<8x512xf32, #tpu.memory_space<vmem>>, vector<8x128xf32>
    tpu.vector_store %arg7[%c0_6, %c384], %23 {strides = array<i32>} : memref<8x512xf32, #tpu.memory_space<vmem>>, vector<8x128xf32>,
    %cst_7 = arith.constant 0.000000e+00 : f32
    %25 = vector.broadcast %cst_7 : f32 to vector<8x128xf32>
    %c0_8 = arith.constant 0 : index
    %c0_9 = arith.constant 0 : index
    %26 = vector.load %arg8[%c0_8, %c0_9] : memref<8x512xf32, #tpu.memory_space<vmem>>, vector<8x128xf32>
    tpu.vector_store %arg8[%c0_8, %c0_9], %25 {strides = array<i32>} : memref<8x512xf32, #tpu.memory_space<vmem>>, vector<8x128xf32>,
    %cst_10 = arith.constant 0.000000e+00 : f32
    %27 = vector.broadcast %cst_10 : f32 to vector<8x128xf32>
    %c0_11 = arith.constant 0 : index
    %c384_12 = arith.constant 384 : index
    %28 = vector.load %arg8[%c0_11, %c384_12] : memref<8x512xf32, #tpu.memory_space<vmem>>, vector<8x128xf32>
    tpu.vector_store %arg8[%c0_11, %c384_12], %27 {strides = array<i32>} : memref<8x512xf32, #tpu.memory_space<vmem>>, vector<8x128xf32>,
    %c0_13 = arith.constant 0 : index
    %c0_14 = arith.constant 0 : index
    %c0_15 = arith.constant 0 : index
    %29 = vector.load %arg1[%c0_13, %c0_14, %c0_15] : memref<2x8x256xf32, #tpu.memory_space<vmem>>, vector<1x8x256xf32>
    %30 = vector.shape_cast %29 : vector<1x8x256xf32> to vector<8x256xf32>
    %c0_16 = arith.constant 0 : index
    %c128 = arith.constant 128 : index
    %31 = vector.load %arg7[%c0_16, %c128] : memref<8x512xf32, #tpu.memory_space<vmem>>, vector<8x256xf32>
    tpu.vector_store %arg7[%c0_16, %c128], %30 {strides = array<i32>} : memref<8x512xf32, #tpu.memory_space<vmem>>, vector<8x256xf32>,
    %c0_17 = arith.constant 0 : index
    %c111 = arith.constant 111 : index
    %32 = vector.load %arg7[%c0_17, %c111] : memref<8x512xf32, #tpu.memory_space<vmem>>, vector<8x256xf32>
    %cst_18 = arith.constant 0.000000e+00 : f32
    %33 = vector.broadcast %cst_18 : f32 to vector<8x256xf32>
    %34 = vector.shape_cast %18 : vector<1x256xi1> to vector<1x256xi1>
    %35 = vector.broadcast %34 : vector<1x256xi1> to vector<8x256xi1>
    %36 = arith.select %35, %32, %33 : vector<8x256xi1>, vector<8x256xf32>
    %c0_19 = arith.constant 0 : index
    %c112 = arith.constant 112 : index
    %37 = vector.load %arg7[%c0_19, %c112] : memref<8x512xf32, #tpu.memory_space<vmem>>, vector<8x256xf32>
    %c0_20 = arith.constant 0 : index
    %c113 = arith.constant 113 : index
    %38 = vector.load %arg7[%c0_20, %c113] : memref<8x512xf32, #tpu.memory_space<vmem>>, vector<8x256xf32>
    %cst_21 = arith.constant 0.000000e+00 : f32
    %39 = vector.broadcast %cst_21 : f32 to vector<8x256xf32>
    %40 = vector.shape_cast %20 : vector<1x256xi1> to vector<1x256xi1>
    %41 = vector.broadcast %40 : vector<1x256xi1> to vector<8x256xi1>
    %42 = arith.select %41, %38, %39 : vector<8x256xi1>, vector<8x256xf32>
    %c0_22 = arith.constant 0 : index
    %c127 = arith.constant 127 : index
    %43 = vector.load %arg7[%c0_22, %c127] : memref<8x512xf32, #tpu.memory_space<vmem>>, vector<8x256xf32>
    %cst_23 = arith.constant 0.000000e+00 : f32
    %44 = vector.broadcast %cst_23 : f32 to vector<8x256xf32>
    %45 = vector.shape_cast %18 : vector<1x256xi1> to vector<1x256xi1>
    %46 = vector.broadcast %45 : vector<1x256xi1> to vector<8x256xi1>
    %47 = arith.select %46, %43, %44 : vector<8x256xi1>, vector<8x256xf32>
    %c0_24 = arith.constant 0 : index
    %c128_25 = arith.constant 128 : index
    %48 = vector.load %arg7[%c0_24, %c128_25] : memref<8x512xf32, #tpu.memory_space<vmem>>, vector<8x256xf32>
    %c0_26 = arith.constant 0 : index
    %c129 = arith.constant 129 : index
    %49 = vector.load %arg7[%c0_26, %c129] : memref<8x512xf32, #tpu.memory_space<vmem>>, vector<8x256xf32>
    %cst_27 = arith.constant 0.000000e+00 : f32
    %50 = vector.broadcast %cst_27 : f32 to vector<8x256xf32>
    %51 = vector.shape_cast %20 : vector<1x256xi1> to vector<1x256xi1>
    %52 = vector.broadcast %51 : vector<1x256xi1> to vector<8x256xi1>
    %53 = arith.select %52, %49, %50 : vector<8x256xi1>, vector<8x256xf32>
    %c0_28 = arith.constant 0 : index
    %c143 = arith.constant 143 : index
    %54 = vector.load %arg7[%c0_28, %c143] : memref<8x512xf32, #tpu.memory_space<vmem>>, vector<8x256xf32>
    %cst_29 = arith.constant 0.000000e+00 : f32
    %55 = vector.broadcast %cst_29 : f32 to vector<8x256xf32>
    %56 = vector.shape_cast %18 : vector<1x256xi1> to vector<1x256xi1>
    %57 = vector.broadcast %56 : vector<1x256xi1> to vector<8x256xi1>
    %58 = arith.select %57, %54, %55 : vector<8x256xi1>, vector<8x256xf32>
    %c0_30 = arith.constant 0 : index
    %c144 = arith.constant 144 : index
    %59 = vector.load %arg7[%c0_30, %c144] : memref<8x512xf32, #tpu.memory_space<vmem>>, vector<8x256xf32>
    %c0_31 = arith.constant 0 : index
    %c145 = arith.constant 145 : index
    %60 = vector.load %arg7[%c0_31, %c145] : memref<8x512xf32, #tpu.memory_space<vmem>>, vector<8x256xf32>
    %cst_32 = arith.constant 0.000000e+00 : f32
    %61 = vector.broadcast %cst_32 : f32 to vector<8x256xf32>
    %62 = vector.shape_cast %20 : vector<1x256xi1> to vector<1x256xi1>
    %63 = vector.broadcast %62 : vector<1x256xi1> to vector<8x256xi1>
    %64 = arith.select %63, %60, %61 : vector<8x256xi1>, vector<8x256xf32>
    %65 = tpu.concatenate %36, %37, %42, %47, %48, %53, %58, %59, %64 in 0 : vector<8x256xf32>, vector<8x256xf32>, vector<8x256xf32>, vector<8x256xf32>, vector<8x256xf32>, vector<8x256xf32>, vector<8x256xf32>, vector<8x256xf32>, vector<8x256xf32> -> vector<72x256xf32>
    %c0_33 = arith.constant 0 : index
    %c0_34 = arith.constant 0 : index
    %66 = vector.load %arg2[%c0_33, %c0_34] : memref<8x72xf32, #tpu.memory_space<vmem>>, vector<8x72xf32>
    %cst_35 = arith.constant dense<0.000000e+00> : vector<8x256xf32>
    %67 = tpu.matmul %66, %65, %cst_35 {dimension_numbers = #tpu.dot_dimension_numbers<[1], [0], [0], [1], [0, 0, 1, 1], [], []>} : vector<8x72xf32>, vector<72x256xf32>, vector<8x256xf32> -> vector<8x256xf32>
    %c0_36 = arith.constant 0 : index
    %c0_37 = arith.constant 0 : index
    %68 = vector.load %arg4[%c0_36, %c0_37] : memref<8x1xf32, #tpu.memory_space<vmem>>, vector<8x1xf32>
    %69 = vector.broadcast %68 : vector<8x1xf32> to vector<8x256xf32>
    %70 = arith.addf %67, %69 : vector<8x256xf32>
    %cst_38 = arith.constant 0.000000e+00 : f32
    %71 = vector.broadcast %cst_38 : f32 to vector<8x256xf32>
    %72 = arith.maximumf %70, %71 : vector<8x256xf32>
    %c0_39 = arith.constant 0 : index
    %c128_40 = arith.constant 128 : index
    %73 = vector.load %arg8[%c0_39, %c128_40] : memref<8x512xf32, #tpu.memory_space<vmem>>, vector<8x256xf32>
    tpu.vector_store %arg8[%c0_39, %c128_40], %72 {strides = array<i32>} : memref<8x512xf32, #tpu.memory_space<vmem>>, vector<8x256xf32>,
    %c0_41 = arith.constant 0 : index
    %c111_42 = arith.constant 111 : index
    %74 = vector.load %arg8[%c0_41, %c111_42] : memref<8x512xf32, #tpu.memory_space<vmem>>, vector<8x256xf32>
    %cst_43 = arith.constant 0.000000e+00 : f32
    %75 = vector.broadcast %cst_43 : f32 to vector<8x256xf32>
    %76 = vector.shape_cast %18 : vector<1x256xi1> to vector<1x256xi1>
    %77 = vector.broadcast %76 : vector<1x256xi1> to vector<8x256xi1>
    %78 = arith.select %77, %74, %75 : vector<8x256xi1>, vector<8x256xf32>
    %c0_44 = arith.constant 0 : index
    %c112_45 = arith.constant 112 : index
    %79 = vector.load %arg8[%c0_44, %c112_45] : memref<8x512xf32, #tpu.memory_space<vmem>>, vector<8x256xf32>
    %c0_46 = arith.constant 0 : index
    %c113_47 = arith.constant 113 : index
    %80 = vector.load %arg8[%c0_46, %c113_47] : memref<8x512xf32, #tpu.memory_space<vmem>>, vector<8x256xf32>
    %cst_48 = arith.constant 0.000000e+00 : f32
    %81 = vector.broadcast %cst_48 : f32 to vector<8x256xf32>
    %82 = vector.shape_cast %20 : vector<1x256xi1> to vector<1x256xi1>
    %83 = vector.broadcast %82 : vector<1x256xi1> to vector<8x256xi1>
    %84 = arith.select %83, %80, %81 : vector<8x256xi1>, vector<8x256xf32>
    %c0_49 = arith.constant 0 : index
    %c127_50 = arith.constant 127 : index
    %85 = vector.load %arg8[%c0_49, %c127_50] : memref<8x512xf32, #tpu.memory_space<vmem>>, vector<8x256xf32>
    %cst_51 = arith.constant 0.000000e+00 : f32
    %86 = vector.broadcast %cst_51 : f32 to vector<8x256xf32>
    %87 = vector.shape_cast %18 : vector<1x256xi1> to vector<1x256xi1>
    %88 = vector.broadcast %87 : vector<1x256xi1> to vector<8x256xi1>
    %89 = arith.select %88, %85, %86 : vector<8x256xi1>, vector<8x256xf32>
    %c0_52 = arith.constant 0 : index
    %c128_53 = arith.constant 128 : index
    %90 = vector.load %arg8[%c0_52, %c128_53] : memref<8x512xf32, #tpu.memory_space<vmem>>, vector<8x256xf32>
    %c0_54 = arith.constant 0 : index
    %c129_55 = arith.constant 129 : index
    %91 = vector.load %arg8[%c0_54, %c129_55] : memref<8x512xf32, #tpu.memory_space<vmem>>, vector<8x256xf32>
    %cst_56 = arith.constant 0.000000e+00 : f32
    %92 = vector.broadcast %cst_56 : f32 to vector<8x256xf32>
    %93 = vector.shape_cast %20 : vector<1x256xi1> to vector<1x256xi1>
    %94 = vector.broadcast %93 : vector<1x256xi1> to vector<8x256xi1>
    %95 = arith.select %94, %91, %92 : vector<8x256xi1>, vector<8x256xf32>
    %c0_57 = arith.constant 0 : index
    %c143_58 = arith.constant 143 : index
    %96 = vector.load %arg8[%c0_57, %c143_58] : memref<8x512xf32, #tpu.memory_space<vmem>>, vector<8x256xf32>
    %cst_59 = arith.constant 0.000000e+00 : f32
    %97 = vector.broadcast %cst_59 : f32 to vector<8x256xf32>
    %98 = vector.shape_cast %18 : vector<1x256xi1> to vector<1x256xi1>
    %99 = vector.broadcast %98 : vector<1x256xi1> to vector<8x256xi1>
    %100 = arith.select %99, %96, %97 : vector<8x256xi1>, vector<8x256xf32>
    %c0_60 = arith.constant 0 : index
    %c144_61 = arith.constant 144 : index
    %101 = vector.load %arg8[%c0_60, %c144_61] : memref<8x512xf32, #tpu.memory_space<vmem>>, vector<8x256xf32>
    %c0_62 = arith.constant 0 : index
    %c145_63 = arith.constant 145 : index
    %102 = vector.load %arg8[%c0_62, %c145_63] : memref<8x512xf32, #tpu.memory_space<vmem>>, vector<8x256xf32>
    %cst_64 = arith.constant 0.000000e+00 : f32
    %103 = vector.broadcast %cst_64 : f32 to vector<8x256xf32>
    %104 = vector.shape_cast %20 : vector<1x256xi1> to vector<1x256xi1>
    %105 = vector.broadcast %104 : vector<1x256xi1> to vector<8x256xi1>
    %106 = arith.select %105, %102, %103 : vector<8x256xi1>, vector<8x256xf32>
    %107 = tpu.concatenate %78, %79, %84, %89, %90, %95, %100, %101, %106 in 0 : vector<8x256xf32>, vector<8x256xf32>, vector<8x256xf32>, vector<8x256xf32>, vector<8x256xf32>, vector<8x256xf32>, vector<8x256xf32>, vector<8x256xf32>, vector<8x256xf32> -> vector<72x256xf32>
    %c0_65 = arith.constant 0 : index
    %c0_66 = arith.constant 0 : index
    %108 = vector.load %arg3[%c0_65, %c0_66] : memref<8x72xf32, #tpu.memory_space<vmem>>, vector<8x72xf32>
    %cst_67 = arith.constant dense<0.000000e+00> : vector<8x256xf32>
    %109 = tpu.matmul %108, %107, %cst_67 {dimension_numbers = #tpu.dot_dimension_numbers<[1], [0], [0], [1], [0, 0, 1, 1], [], []>} : vector<8x72xf32>, vector<72x256xf32>, vector<8x256xf32> -> vector<8x256xf32>
    %c0_68 = arith.constant 0 : index
    %c0_69 = arith.constant 0 : index
    %110 = vector.load %arg5[%c0_68, %c0_69] : memref<8x1xf32, #tpu.memory_space<vmem>>, vector<8x1xf32>
    %111 = vector.broadcast %110 : vector<8x1xf32> to vector<8x256xf32>
    %112 = arith.addf %109, %111 : vector<8x256xf32>
    %113 = arith.addf %112, %30 : vector<8x256xf32>
    %cst_70 = arith.constant 0.000000e+00 : f32
    %114 = vector.broadcast %cst_70 : f32 to vector<8x256xf32>
    %115 = arith.maximumf %113, %114 : vector<8x256xf32>
    %c0_71 = arith.constant 0 : index
    %c0_72 = arith.constant 0 : index
    %c0_73 = arith.constant 0 : index
    %116 = vector.load %arg6[%c0_71, %c0_72, %c0_73] : memref<2x8x256xf32, #tpu.memory_space<vmem>>, vector<1x8x256xf32>
    %117 = vector.shape_cast %116 : vector<1x8x256xf32> to vector<8x256xf32>
    %118 = vector.shape_cast %115 : vector<8x256xf32> to vector<1x8x256xf32>
    tpu.vector_store %arg6[%c0_71, %c0_72, %c0_73], %118 {strides = array<i32>} : memref<2x8x256xf32, #tpu.memory_space<vmem>>, vector<1x8x256xf32>,
    %c1 = arith.constant 1 : index
    %c0_74 = arith.constant 0 : index
    %c0_75 = arith.constant 0 : index
    %119 = vector.load %arg1[%c1, %c0_74, %c0_75] : memref<2x8x256xf32, #tpu.memory_space<vmem>>, vector<1x8x256xf32>
    %120 = vector.shape_cast %119 : vector<1x8x256xf32> to vector<8x256xf32>
    %c0_76 = arith.constant 0 : index
    %c128_77 = arith.constant 128 : index
    %121 = vector.load %arg7[%c0_76, %c128_77] : memref<8x512xf32, #tpu.memory_space<vmem>>, vector<8x256xf32>
    tpu.vector_store %arg7[%c0_76, %c128_77], %120 {strides = array<i32>} : memref<8x512xf32, #tpu.memory_space<vmem>>, vector<8x256xf32>,
    %c0_78 = arith.constant 0 : index
    %c111_79 = arith.constant 111 : index
    %122 = vector.load %arg7[%c0_78, %c111_79] : memref<8x512xf32, #tpu.memory_space<vmem>>, vector<8x256xf32>
    %cst_80 = arith.constant 0.000000e+00 : f32
    %123 = vector.broadcast %cst_80 : f32 to vector<8x256xf32>
    %124 = vector.shape_cast %18 : vector<1x256xi1> to vector<1x256xi1>
    %125 = vector.broadcast %124 : vector<1x256xi1> to vector<8x256xi1>
    %126 = arith.select %125, %122, %123 : vector<8x256xi1>, vector<8x256xf32>
    %c0_81 = arith.constant 0 : index
    %c112_82 = arith.constant 112 : index
    %127 = vector.load %arg7[%c0_81, %c112_82] : memref<8x512xf32, #tpu.memory_space<vmem>>, vector<8x256xf32>
    %c0_83 = arith.constant 0 : index
    %c113_84 = arith.constant 113 : index
    %128 = vector.load %arg7[%c0_83, %c113_84] : memref<8x512xf32, #tpu.memory_space<vmem>>, vector<8x256xf32>
    %cst_85 = arith.constant 0.000000e+00 : f32
    %129 = vector.broadcast %cst_85 : f32 to vector<8x256xf32>
    %130 = vector.shape_cast %20 : vector<1x256xi1> to vector<1x256xi1>
    %131 = vector.broadcast %130 : vector<1x256xi1> to vector<8x256xi1>
    %132 = arith.select %131, %128, %129 : vector<8x256xi1>, vector<8x256xf32>
    %c0_86 = arith.constant 0 : index
    %c127_87 = arith.constant 127 : index
    %133 = vector.load %arg7[%c0_86, %c127_87] : memref<8x512xf32, #tpu.memory_space<vmem>>, vector<8x256xf32>
    %cst_88 = arith.constant 0.000000e+00 : f32
    %134 = vector.broadcast %cst_88 : f32 to vector<8x256xf32>
    %135 = vector.shape_cast %18 : vector<1x256xi1> to vector<1x256xi1>
    %136 = vector.broadcast %135 : vector<1x256xi1> to vector<8x256xi1>
    %137 = arith.select %136, %133, %134 : vector<8x256xi1>, vector<8x256xf32>
    %c0_89 = arith.constant 0 : index
    %c128_90 = arith.constant 128 : index
    %138 = vector.load %arg7[%c0_89, %c128_90] : memref<8x512xf32, #tpu.memory_space<vmem>>, vector<8x256xf32>
    %c0_91 = arith.constant 0 : index
    %c129_92 = arith.constant 129 : index
    %139 = vector.load %arg7[%c0_91, %c129_92] : memref<8x512xf32, #tpu.memory_space<vmem>>, vector<8x256xf32>
    %cst_93 = arith.constant 0.000000e+00 : f32
    %140 = vector.broadcast %cst_93 : f32 to vector<8x256xf32>
    %141 = vector.shape_cast %20 : vector<1x256xi1> to vector<1x256xi1>
    %142 = vector.broadcast %141 : vector<1x256xi1> to vector<8x256xi1>
    %143 = arith.select %142, %139, %140 : vector<8x256xi1>, vector<8x256xf32>
    %c0_94 = arith.constant 0 : index
    %c143_95 = arith.constant 143 : index
    %144 = vector.load %arg7[%c0_94, %c143_95] : memref<8x512xf32, #tpu.memory_space<vmem>>, vector<8x256xf32>
    %cst_96 = arith.constant 0.000000e+00 : f32
    %145 = vector.broadcast %cst_96 : f32 to vector<8x256xf32>
    %146 = vector.shape_cast %18 : vector<1x256xi1> to vector<1x256xi1>
    %147 = vector.broadcast %146 : vector<1x256xi1> to vector<8x256xi1>
    %148 = arith.select %147, %144, %145 : vector<8x256xi1>, vector<8x256xf32>
    %c0_97 = arith.constant 0 : index
    %c144_98 = arith.constant 144 : index
    %149 = vector.load %arg7[%c0_97, %c144_98] : memref<8x512xf32, #tpu.memory_space<vmem>>, vector<8x256xf32>
    %c0_99 = arith.constant 0 : index
    %c145_100 = arith.constant 145 : index
    %150 = vector.load %arg7[%c0_99, %c145_100] : memref<8x512xf32, #tpu.memory_space<vmem>>, vector<8x256xf32>
    %cst_101 = arith.constant 0.000000e+00 : f32
    %151 = vector.broadcast %cst_101 : f32 to vector<8x256xf32>
    %152 = vector.shape_cast %20 : vector<1x256xi1> to vector<1x256xi1>
    %153 = vector.broadcast %152 : vector<1x256xi1> to vector<8x256xi1>
    %154 = arith.select %153, %150, %151 : vector<8x256xi1>, vector<8x256xf32>
    %155 = tpu.concatenate %126, %127, %132, %137, %138, %143, %148, %149, %154 in 0 : vector<8x256xf32>, vector<8x256xf32>, vector<8x256xf32>, vector<8x256xf32>, vector<8x256xf32>, vector<8x256xf32>, vector<8x256xf32>, vector<8x256xf32>, vector<8x256xf32> -> vector<72x256xf32>
    %c0_102 = arith.constant 0 : index
    %c0_103 = arith.constant 0 : index
    %156 = vector.load %arg2[%c0_102, %c0_103] : memref<8x72xf32, #tpu.memory_space<vmem>>, vector<8x72xf32>
    %cst_104 = arith.constant dense<0.000000e+00> : vector<8x256xf32>
    %157 = tpu.matmul %156, %155, %cst_104 {dimension_numbers = #tpu.dot_dimension_numbers<[1], [0], [0], [1], [0, 0, 1, 1], [], []>} : vector<8x72xf32>, vector<72x256xf32>, vector<8x256xf32> -> vector<8x256xf32>
    %c0_105 = arith.constant 0 : index
    %c0_106 = arith.constant 0 : index
    %158 = vector.load %arg4[%c0_105, %c0_106] : memref<8x1xf32, #tpu.memory_space<vmem>>, vector<8x1xf32>
    %159 = vector.broadcast %158 : vector<8x1xf32> to vector<8x256xf32>
    %160 = arith.addf %157, %159 : vector<8x256xf32>
    %cst_107 = arith.constant 0.000000e+00 : f32
    %161 = vector.broadcast %cst_107 : f32 to vector<8x256xf32>
    %162 = arith.maximumf %160, %161 : vector<8x256xf32>
    %c0_108 = arith.constant 0 : index
    %c128_109 = arith.constant 128 : index
    %163 = vector.load %arg8[%c0_108, %c128_109] : memref<8x512xf32, #tpu.memory_space<vmem>>, vector<8x256xf32>
    tpu.vector_store %arg8[%c0_108, %c128_109], %162 {strides = array<i32>} : memref<8x512xf32, #tpu.memory_space<vmem>>, vector<8x256xf32>,
    %c0_110 = arith.constant 0 : index
    %c111_111 = arith.constant 111 : index
    %164 = vector.load %arg8[%c0_110, %c111_111] : memref<8x512xf32, #tpu.memory_space<vmem>>, vector<8x256xf32>
    %cst_112 = arith.constant 0.000000e+00 : f32
    %165 = vector.broadcast %cst_112 : f32 to vector<8x256xf32>
    %166 = vector.shape_cast %18 : vector<1x256xi1> to vector<1x256xi1>
    %167 = vector.broadcast %166 : vector<1x256xi1> to vector<8x256xi1>
    %168 = arith.select %167, %164, %165 : vector<8x256xi1>, vector<8x256xf32>
    %c0_113 = arith.constant 0 : index
    %c112_114 = arith.constant 112 : index
    %169 = vector.load %arg8[%c0_113, %c112_114] : memref<8x512xf32, #tpu.memory_space<vmem>>, vector<8x256xf32>
    %c0_115 = arith.constant 0 : index
    %c113_116 = arith.constant 113 : index
    %170 = vector.load %arg8[%c0_115, %c113_116] : memref<8x512xf32, #tpu.memory_space<vmem>>, vector<8x256xf32>
    %cst_117 = arith.constant 0.000000e+00 : f32
    %171 = vector.broadcast %cst_117 : f32 to vector<8x256xf32>
    %172 = vector.shape_cast %20 : vector<1x256xi1> to vector<1x256xi1>
    %173 = vector.broadcast %172 : vector<1x256xi1> to vector<8x256xi1>
    %174 = arith.select %173, %170, %171 : vector<8x256xi1>, vector<8x256xf32>
    %c0_118 = arith.constant 0 : index
    %c127_119 = arith.constant 127 : index
    %175 = vector.load %arg8[%c0_118, %c127_119] : memref<8x512xf32, #tpu.memory_space<vmem>>, vector<8x256xf32>
    %cst_120 = arith.constant 0.000000e+00 : f32
    %176 = vector.broadcast %cst_120 : f32 to vector<8x256xf32>
    %177 = vector.shape_cast %18 : vector<1x256xi1> to vector<1x256xi1>
    %178 = vector.broadcast %177 : vector<1x256xi1> to vector<8x256xi1>
    %179 = arith.select %178, %175, %176 : vector<8x256xi1>, vector<8x256xf32>
    %c0_121 = arith.constant 0 : index
    %c128_122 = arith.constant 128 : index
    %180 = vector.load %arg8[%c0_121, %c128_122] : memref<8x512xf32, #tpu.memory_space<vmem>>, vector<8x256xf32>
    %c0_123 = arith.constant 0 : index
    %c129_124 = arith.constant 129 : index
    %181 = vector.load %arg8[%c0_123, %c129_124] : memref<8x512xf32, #tpu.memory_space<vmem>>, vector<8x256xf32>
    %cst_125 = arith.constant 0.000000e+00 : f32
    %182 = vector.broadcast %cst_125 : f32 to vector<8x256xf32>
    %183 = vector.shape_cast %20 : vector<1x256xi1> to vector<1x256xi1>
    %184 = vector.broadcast %183 : vector<1x256xi1> to vector<8x256xi1>
    %185 = arith.select %184, %181, %182 : vector<8x256xi1>, vector<8x256xf32>
    %c0_126 = arith.constant 0 : index
    %c143_127 = arith.constant 143 : index
    %186 = vector.load %arg8[%c0_126, %c143_127] : memref<8x512xf32, #tpu.memory_space<vmem>>, vector<8x256xf32>
    %cst_128 = arith.constant 0.000000e+00 : f32
    %187 = vector.broadcast %cst_128 : f32 to vector<8x256xf32>
    %188 = vector.shape_cast %18 : vector<1x256xi1> to vector<1x256xi1>
    %189 = vector.broadcast %188 : vector<1x256xi1> to vector<8x256xi1>
    %190 = arith.select %189, %186, %187 : vector<8x256xi1>, vector<8x256xf32>
    %c0_129 = arith.constant 0 : index
    %c144_130 = arith.constant 144 : index
    %191 = vector.load %arg8[%c0_129, %c144_130] : memref<8x512xf32, #tpu.memory_space<vmem>>, vector<8x256xf32>
    %c0_131 = arith.constant 0 : index
    %c145_132 = arith.constant 145 : index
    %192 = vector.load %arg8[%c0_131, %c145_132] : memref<8x512xf32, #tpu.memory_space<vmem>>, vector<8x256xf32>
    %cst_133 = arith.constant 0.000000e+00 : f32
    %193 = vector.broadcast %cst_133 : f32 to vector<8x256xf32>
    %194 = vector.shape_cast %20 : vector<1x256xi1> to vector<1x256xi1>
    %195 = vector.broadcast %194 : vector<1x256xi1> to vector<8x256xi1>
    %196 = arith.select %195, %192, %193 : vector<8x256xi1>, vector<8x256xf32>
    %197 = tpu.concatenate %168, %169, %174, %179, %180, %185, %190, %191, %196 in 0 : vector<8x256xf32>, vector<8x256xf32>, vector<8x256xf32>, vector<8x256xf32>, vector<8x256xf32>, vector<8x256xf32>, vector<8x256xf32>, vector<8x256xf32>, vector<8x256xf32> -> vector<72x256xf32>
    %c0_134 = arith.constant 0 : index
    %c0_135 = arith.constant 0 : index
    %198 = vector.load %arg3[%c0_134, %c0_135] : memref<8x72xf32, #tpu.memory_space<vmem>>, vector<8x72xf32>
    %cst_136 = arith.constant dense<0.000000e+00> : vector<8x256xf32>
    %199 = tpu.matmul %198, %197, %cst_136 {dimension_numbers = #tpu.dot_dimension_numbers<[1], [0], [0], [1], [0, 0, 1, 1], [], []>} : vector<8x72xf32>, vector<72x256xf32>, vector<8x256xf32> -> vector<8x256xf32>
    %c0_137 = arith.constant 0 : index
    %c0_138 = arith.constant 0 : index
    %200 = vector.load %arg5[%c0_137, %c0_138] : memref<8x1xf32, #tpu.memory_space<vmem>>, vector<8x1xf32>
    %201 = vector.broadcast %200 : vector<8x1xf32> to vector<8x256xf32>
    %202 = arith.addf %199, %201 : vector<8x256xf32>
    %203 = arith.addf %202, %120 : vector<8x256xf32>
    %cst_139 = arith.constant 0.000000e+00 : f32
    %204 = vector.broadcast %cst_139 : f32 to vector<8x256xf32>
    %205 = arith.maximumf %203, %204 : vector<8x256xf32>
    %c1_140 = arith.constant 1 : index
    %c0_141 = arith.constant 0 : index
    %c0_142 = arith.constant 0 : index
    %206 = vector.load %arg6[%c1_140, %c0_141, %c0_142] : memref<2x8x256xf32, #tpu.memory_space<vmem>>, vector<1x8x256xf32>
    %207 = vector.shape_cast %206 : vector<1x8x256xf32> to vector<8x256xf32>
    %208 = vector.shape_cast %205 : vector<8x256xf32> to vector<1x8x256xf32>
    tpu.vector_store %arg6[%c1_140, %c0_141, %c0_142], %208 {strides = array<i32>} : memref<2x8x256xf32, #tpu.memory_space<vmem>>, vector<1x8x256xf32>,
    return
  }
  func.func @transform_0(%arg0: i32) -> (i32, i32, i32) {
    %c0_i32 = arith.constant 0 : i32
    %c0_i32_0 = arith.constant 0 : i32
    %c0_i32_1 = arith.constant 0 : i32
    return %arg0, %c0_i32, %c0_i32_0 : i32, i32, i32
  }
  func.func @transform_1(%arg0: i32) -> (i32, i32) {
    %c0_i32 = arith.constant 0 : i32
    %c0_i32_0 = arith.constant 0 : i32
    %c0_i32_1 = arith.constant 0 : i32
    return %c0_i32, %c0_i32_0 : i32, i32
  }
  func.func @transform_2(%arg0: i32) -> (i32, i32) {
    %c0_i32 = arith.constant 0 : i32
    %c0_i32_0 = arith.constant 0 : i32
    %c0_i32_1 = arith.constant 0 : i32
    return %c0_i32, %c0_i32_0 : i32, i32
  }
  func.func @transform_3(%arg0: i32) -> (i32, i32) {
    %c0_i32 = arith.constant 0 : i32
    %c0_i32_0 = arith.constant 0 : i32
    %c0_i32_1 = arith.constant 0 : i32
    return %c0_i32, %c0_i32_0 : i32, i32
  }
  func.func @transform_4(%arg0: i32) -> (i32, i32) {
    %c0_i32 = arith.constant 0 : i32
    %c0_i32_0 = arith.constant 0 : i32
    %c0_i32_1 = arith.constant 0 : i32
    return %c0_i32, %c0_i32_0 : i32, i32
  }
  func.func @transform_5(%arg0: i32) -> (i32, i32, i32) {
    %c0_i32 = arith.constant 0 : i32
    %c0_i32_0 = arith.constant 0 : i32
    %c0_i32_1 = arith.constant 0 : i32
    return %arg0, %c0_i32, %c0_i32_0 : i32, i32, i32
  }
}

</mosaic_0001>

<bundles_post_ra>
// kernel: resnet_block_forward.1
= control target key start
LH: loop header
LB: loop body
LE: loop exit
PB: predicated region body
PF: predicated region fallthrough
CT: control target
= control target key end

     0   :  { %s1282_s18 = smov 0   ;;  %s1752_s0 = inlined_call_operand.vmem [shape: f32[8,8,256], index: 0, kind: input, shape index: {}]   ;;  %s1753_s1 = inlined_call_operand.vmem [shape: f32[8,72], index: 1, kind: input, shape index: {}]   ;;  %s1754_s2 = inlined_call_operand.vmem [shape: f32[8,72], index: 2, kind: input, shape index: {}]   ;;  %s1755_s3 = inlined_call_operand.vmem [shape: f32[8,1], index: 3, kind: input, shape index: {}]   ;;  %s1756_s4 = inlined_call_operand.vmem [shape: f32[8,1], index: 4, kind: input, shape index: {}]   ;;  %s1757_s5 = inlined_call_operand.vmem [shape: f32[8,8,256], index: 5, kind: output, shape index: {}]  }
   0x1 LB: > { %s1113_s19 = sadd.s32 4294967295, %s1240_s18   ;;  %p1117_p0 = scmp.ge.s32.totalorder %s1240_s18, 1  ;;  %s1240_s18 = sphi %s1282_s18, %s15_s18  }
   0x2   : > { %p189_p1 = scmp.lt.s32.totalorder %s1240_s18, 5 }
   0x4   : > { %p190_p2 = pnand %p1117_p0, %p189_p1 }
   0x5   : > { %s1118_s20 = sshll.u32 (!%p190_p2), %s1113_s19, 1  ;;  %s1243_s21 = smov (!%p190_p2), 111  }
   0x6   : > { %193 = sbr.rel (%p190_p2) target bundleno = 770 (0x302), region = 40  ;;  %p220_p3 = scmp.lt.s32.totalorder (!%p190_p2), %s1118_s20, 7 }
   0x7   : > { %s1244_s23 = smov (!%p190_p2), 112   ;;  %s1245_s27 = smov (!%p190_p2), 113  }
   0x8   : > { %s1246_s28 = smov (!%p190_p2), 127   ;;  %s1247_s29 = smov (!%p190_p2), 1  }
   0x9   : > { %s1248_s30 = smov (!%p190_p2), 15   ;;  %s1249_s6 = smov (!%p190_p2), 16  }
   0xa   : > { %s1250_s7 = smov (!%p190_p2), 17  }
   0xb   : > { %v1242_v0 = vmov 0.0   ;;  %s1767_s20 = smov (!%p220_p3, %s1118_s20), 7  ;;  %v1251_v5 = vmov 0   ;;  %v393_v6 = vld [vmem:[%s1755_s3] sm:$0xff]  ;;  %v233_v7 = vlaneseq  ;;  %vm363_vm0 = vcmask 908288  }
   0xc   : > { %467 = vmatprep.mubr.f32.mxu0 %v1242_v0  ;;  %656 = vmatprep.mubr.f32.mxu1 %v1242_v0  ;;  %s1182_s22 = sshll.u32 %s1767_s20, 4  ;;  %vm387_vm3 = vcmask 916480   ;;  %vm350_vm4 = vcmask 924672   ;;  %vm337_vm6 = vcmask 1039360   ;;  %vm318_vm8 = vcmask 7168   ;;  %v392_v60 = vld [vmem:[%s1753_s1] sm:$0xff] }
   0xd   : > { %1203 = vrot.lane.b32.xlu0 %v1242_v0, %s1243_s21  ;;  %s1304_s26 = scalar_lea.vmem %s1752_s0, %s1182_s22  ;;  %1217 = vset.pattern.permute.xlu1 %v1251_v5  ;;  %v234_v8 = vand.u32 127, %v233_v7  ;;  %vm305_vm9 = vcmask 121856   ;;  %vm376_vm10 = vcmask 130048   ;;  %vm288_vm11 = vcmask 138240   ;;  %s231_s19 = scalar_lea.vmem %s1757_s5, %s1182_s22 }
   0xe   : > { %v1307_v1 = vld [vmem:[%s1304_s26] sm:$0xff]  ;;  %v1310_v2 = vld [vmem:[%s1304_s26 + $0x8] sm:$0xff]  ;;  %v1353_v3 = vld [vmem:[%s1304_s26 + $0x18] sm:$0xff]  ;;  %1218 = vset.pattern.permute.xlu0 %v1251_v5  ;;  %vm399_vm12 = vcmask 588800  }
   0xf   : > { %357 = vrot.lane.b32.xlu1 %v1307_v1, %s1243_s21  ;;  %v1362_v4 = vld [vmem:[%s1304_s26 + $0x10] sm:$0xff]  ;;  %v235_v9 = vadd.s32 128, %v234_v8  ;;  %v240_v13 = vand.u32 15, %v234_v8 }
  0x11   : > { %1208 = vrot.lane.b32.xlu0 %v1242_v0, %s1244_s23  ;;  %v247_v11 = vand.u32 15, %v235_v9  ;;  %vm1439_vm2 = vcmp.ne.s32.totalorder %v240_v13, 15  ;;  %vm1460_vm7 = vcmp.ne.s32.totalorder %v240_v13, 0 }
  0x13   : > { %383 = vrot.lane.b32.xlu1 %v1310_v2, %s1244_s23  ;;  %vm1435_vm1 = vcmp.ne.s32.totalorder %v247_v11, 15  ;;  %vm1456_vm5 = vcmp.ne.s32.totalorder %v247_v11, 0 }
  0x15   : > { %359 = vrot.lane.b32.xlu0 %v1310_v2, %s1243_s21 }
  0x17   : > { %381 = vrot.lane.b32.xlu1 %v1307_v1, %s1244_s23 }
  0x19   : > { %346 = vrot.lane.b32.xlu0 %v1310_v2, %s1245_s27 }
  0x1b   : > { %1213 = vrot.lane.b32.xlu1 %v1242_v0, %s1245_s27 }
  0x1d   : > { %344 = vrot.lane.b32.xlu0 %v1307_v1, %s1245_s27 }
  0x1f   : > { %333 = vrot.lane.b32.xlu1 %v1310_v2, %s1246_s28 }
  0x21   : > { %335 = vrot.lane.b32.xlu0 %v1242_v0, %s1246_s28 }
  0x23   : > { %331 = vrot.lane.b32.xlu1 %v1307_v1, %s1246_s28 }
  0x25   : > { %314 = vrot.lane.b32.xlu0 %v1307_v1, %s1247_s29 }
  0x27   : > { %316 = vrot.lane.b32.xlu1 %v1310_v2, %s1247_s29 }
  0x29   : > { %312 = vrot.lane.b32.xlu0 %v1242_v0, %s1247_s29 }
  0x2b   : > { %301 = vrot.lane.b32.xlu1 %v1307_v1, %s1248_s30 }
  0x2d   : > { %303 = vrot.lane.b32.xlu0 %v1310_v2, %s1248_s30 }
  0x2f   : > { %299 = vrot.lane.b32.xlu1 %v1242_v0, %s1248_s30 }
  0x31   : > { %372 = vrot.lane.b32.xlu0 %v1307_v1, %s1249_s6 }
  0x33   : > { %374 = vrot.lane.b32.xlu1 %v1310_v2, %s1249_s6 }
  0x35   : > { %370 = vrot.lane.b32.xlu0 %v1242_v0, %s1249_s6 }
  0x37   : > { %284 = vrot.lane.b32.xlu1 %v1307_v1, %s1250_s7 }
  0x39   : > { %286 = vrot.lane.b32.xlu0 %v1310_v2, %s1250_s7 }
  0x3b   : > { %282 = vrot.lane.b32.xlu1 %v1242_v0, %s1250_s7 }
  0x3d   : > { %748 = vrot.lane.b32.xlu0 %v1353_v3, %s1243_s21 }
  0x3f   : > { %746 = vrot.lane.b32.xlu1 %v1362_v4, %s1243_s21 }
  0x41   : > { %770 = vrot.lane.b32.xlu0 %v1353_v3, %s1244_s23 }
  0x43   : > { %768 = vrot.lane.b32.xlu1 %v1362_v4, %s1244_s23 }
  0x45   : > { %736 = vrot.lane.b32.xlu0 %v1353_v3, %s1245_s27 }
  0x47   : > { %734 = vrot.lane.b32.xlu1 %v1362_v4, %s1245_s27 }
  0x49   : > { %724 = vrot.lane.b32.xlu0 %v1353_v3, %s1246_s28 }
  0x4b   : > { %726 = vrot.lane.b32.xlu1 %v1242_v0, %s1246_s28 }
  0x4d   : > { %722 = vrot.lane.b32.xlu0 %v1362_v4, %s1246_s28 }
  0x4f   : > { %706 = vrot.lane.b32.xlu1 %v1362_v4, %s1247_s29 }
  0x51   : > { %708 = vrot.lane.b32.xlu0 %v1353_v3, %s1247_s29 }
  0x53   : > { %704 = vrot.lane.b32.xlu1 %v1242_v0, %s1247_s29 }
  0x55   : > { %694 = vrot.lane.b32.xlu0 %v1362_v4, %s1248_s30 }
  0x57   : > { %696 = vrot.lane.b32.xlu1 %v1353_v3, %s1248_s30 }
  0x59   : > { %692 = vrot.lane.b32.xlu0 %v1242_v0, %s1248_s30 }
  0x5b   : > { %760 = vrot.lane.b32.xlu1 %v1362_v4, %s1249_s6 }
  0x5d   : > { %762 = vrot.lane.b32.xlu0 %v1353_v3, %s1249_s6 }
  0x5f   : > { %758 = vrot.lane.b32.xlu1 %v1242_v0, %s1249_s6 }
  0x61   : > { %682 = vrot.lane.b32.xlu0 %v1362_v4, %s1250_s7 }
  0x63   : > { %684 = vrot.lane.b32.xlu1 %v1353_v3, %s1250_s7 }
  0x65   : > { %680 = vrot.lane.b32.xlu0 %v1242_v0, %s1250_s7 }
  0x67   : > { %396 = vperm.xlu1 %1217, %v393_v6  }
  0x69   : > { %782 = vperm.xlu0 %1218, %v393_v6  }
  0x6b   : > { %1220 = vrot.lane.b32.xlu1 %v1242_v0, %s1243_s21 }
  0x6d   : > { %1225 = vrot.lane.b32.xlu0 %v1242_v0, %s1244_s23 }
  0x6f   : > { %1230 = vrot.lane.b32.xlu1 %v1242_v0, %s1245_s27 }
  0x71   : > { %530 = vrot.lane.b32.xlu0 %v1242_v0, %s1246_s28 }
  0x73   : > { %496 = vrot.lane.b32.xlu1 %v1242_v0, %s1248_s30 }
  0x75   : > { %508 = vrot.lane.b32.xlu0 %v1242_v0, %s1247_s29 }
  0x77   : > { %484 = vrot.lane.b32.xlu1 %v1242_v0, %s1250_s7 }
  0x79   : > { %562 = vrot.lane.b32.xlu0 %v1242_v0, %s1249_s6 }
  0x7b   : > { %915 = vrot.lane.b32.xlu1 %v1242_v0, %s1246_s28 }
  0x7d   : > { %881 = vrot.lane.b32.xlu0 %v1242_v0, %s1248_s30 }
  0x7f   : > { %v1425_v10 = vpop.permute.xlu0 %1203  ;;  %893 = vrot.lane.b32.xlu1 %v1242_v0, %s1247_s29 }
  0x80   : > { %v1205_v15 = vunpack.i.l.bf16 %v1425_v10  ;;  %v1206_v58 = vunpack.i.h.bf16 %v1425_v10 }
  0x81   : > { %v358_v14 = vpop.permute.xlu1 %357 }
  0x83   : > { %v1429_v12 = vpop.permute.xlu0 %1208  ;;  %947 = vrot.lane.b32.xlu1 %v1242_v0, %s1249_s6 }
  0x84   : > { %v1210_v16 = vunpack.i.l.bf16 %v1429_v12  ;;  %v1211_v5 = vunpack.i.h.bf16 %v1429_v12 }
  0x85   : > { %v384_v22 = vpop.permute.xlu1 %383 }
  0x86   : > { %v389_v23 = vsel %vm387_vm3, %v384_v22, %v1210_v16 }
  0x87   : > { %v360_v18 = vpop.permute.xlu0 %359 }
  0x88   : > { %v365_v20 = vsel %vm363_vm0, %v360_v18, %v1205_v15  ;;  %v364_v21 = vsel %vm363_vm0, %v358_v14, %v360_v18 }
  0x89   : > { %1124 = vmatprep.subr.msk.mxu0 %vm1435_vm1, %v365_v20  ;;  %v382_v25 = vpop.permute.xlu1 %381 }
  0x8a   : > { %1125 = vmatpush1.msk.msra.mxu0 %vm1439_vm2, %v364_v21  ;;  %v388_v26 = vsel %vm387_vm3, %v382_v25, %v384_v22 }
  0x8b   : > { %v347_v24 = vpop.permute.xlu0 %346  ;;  %419 = vmatprep.subr.mxu0 %v389_v23 }
  0x8c   : > { %420 = vmatpush1.msra.mxu0 %v388_v26 }
  0x8d   : > { %v1453_v28 = vpop.permute.xlu1 %1213 }
  0x8e   : > { %v1215_v29 = vunpack.i.l.bf16 %v1453_v28  ;;  %v1216_v10 = vunpack.i.h.bf16 %v1453_v28 }
  0x8f   : > { %v345_v27 = vpop.permute.xlu0 %344 }
  0x90   : > { %v352_v33 = vsel %vm350_vm4, %v347_v24, %v1215_v29  ;;  %v351_v34 = vsel %vm350_vm4, %v345_v27, %v347_v24 }
  0x91   : > { %v334_v35 = vpop.permute.xlu1 %333  ;;  %1126 = vmatprep.subr.msk.mxu0 %vm1456_vm5, %v352_v33 }
  0x92   : > { %1127 = vmatpush1.msk.msra.mxu0 %vm1460_vm7, %v351_v34 }
  0x93   : > { %v336_v31 = vpop.permute.xlu0 %335 }
  0x94   : > { %v339_v36 = vsel %vm337_vm6, %v334_v35, %v336_v31 }
  0x95   : > { %1128 = vmatprep.subr.msk.mxu0 %vm1435_vm1, %v339_v36  ;;  %v332_v38 = vpop.permute.xlu1 %331 }
  0x96   : > { %v338_v39 = vsel %vm337_vm6, %v332_v38, %v334_v35 }
  0x97   : > { %v315_v37 = vpop.permute.xlu0 %314  ;;  %1129 = vmatpush1.msk.msra.mxu0 %vm1439_vm2, %v338_v39 }
  0x98   : > { %425 = vmatprep.subr.mxu0 %v1310_v2 }
  0x99   : > { %v317_v41 = vpop.permute.xlu1 %316  ;;  %426 = vmatpush1.msra.mxu0 %v1307_v1 }
  0x9a   : > { %v320_v42 = vsel %vm318_vm8, %v315_v37, %v317_v41 }
  0x9b   : > { %v313_v40 = vpop.permute.xlu0 %312  ;;  %1130 = vmatprep.subr.msk.mxu0 %vm1456_vm5, %v320_v42 }
  0x9c   : > { %v319_v43 = vsel %vm318_vm8, %v313_v40, %v315_v37 }
  0x9d   : > { %1131 = vmatpush1.msk.msra.mxu0 %vm1460_vm7, %v319_v43  ;;  %v302_v45 = vpop.permute.xlu1 %301 }
  0x9f   : > { %v304_v44 = vpop.permute.xlu0 %303 }
  0xa0   : > { %v307_v46 = vsel %vm305_vm9, %v302_v45, %v304_v44 }
  0xa1   : > { %1132 = vmatprep.subr.msk.mxu0 %vm1435_vm1, %v307_v46  ;;  %v300_v48 = vpop.permute.xlu1 %299 }
  0xa2   : > { %v306_v49 = vsel %vm305_vm9, %v300_v48, %v302_v45 }
  0xa3   : > { %v373_v47 = vpop.permute.xlu0 %372  ;;  %1133 = vmatpush1.msk.msra.mxu0 %vm1439_vm2, %v306_v49 }
  0xa5   : > { %v375_v51 = vpop.permute.xlu1 %374 }
  0xa6   : > { %v378_v52 = vsel %vm376_vm10, %v373_v47, %v375_v51 }
  0xa7   : > { %v371_v50 = vpop.permute.xlu0 %370  ;;  %431 = vmatprep.subr.mxu0 %v378_v52 }
  0xa8   : > { %v377_v54 = vsel %vm376_vm10, %v371_v50, %v373_v47 }
  0xa9   : > { %432 = vmatpush1.msra.mxu0 %v377_v54  ;;  %v285_v55 = vpop.permute.xlu1 %284 }
  0xab   : > { %v287_v53 = vpop.permute.xlu0 %286 }
  0xac   : > { %v290_v56 = vsel %vm288_vm11, %v285_v55, %v287_v53 }
  0xad   : > { %1134 = vmatprep.subr.msk.mxu0 %vm1456_vm5, %v290_v56  ;;  %v283_v59 = vpop.permute.xlu1 %282 }
  0xae   : > { %v289_v61 = vsel %vm288_vm11, %v283_v59, %v285_v55  ;;  %v583_v59 = vld [vmem:[%s1756_s4] sm:$0xff] }
  0xaf   : > { %v749_v57 = vpop.permute.xlu0 %748  ;;  %1135 = vmatpush1.msk.msra.mxu0 %vm1460_vm7, %v289_v61 }
  0xb0   : > { %v753_v62 = vsel %vm363_vm0, %v749_v57, %v1206_v58  ;;  %1136 = vmatmul.mubr.msk.f32.vlgmr.msra.gmra.mxu0 %vm399_vm12, %v392_v60 }
  0xb1   : > { %1152 = vmatprep.subr.msk.mxu0 %vm1435_vm1, %v753_v62  ;;  %v747_v6 = vpop.permute.xlu1 %746  ;;  %852 = vmatprep.mubr.f32.mxu0 %v1242_v0 }
  0xb2   : > { %v752_v7 = vsel %vm363_vm0, %v747_v6, %v749_v57 }
  0xb3   : > { %v771_v63 = vpop.permute.xlu0 %770  ;;  %1153 = vmatpush1.msk.msra.mxu0 %vm1439_vm2, %v752_v7 }
  0xb4   : > { %v775_v9 = vsel %vm387_vm3, %v771_v63, %v1211_v5 }
  0xb5   : > { %804 = vmatprep.subr.mxu0 %v775_v9  ;;  %v769_v11 = vpop.permute.xlu1 %768 }
  0xb6   : > { %v774_v13 = vsel %vm387_vm3, %v769_v11, %v771_v63 }
  0xb7   : > { %v737_v8 = vpop.permute.xlu0 %736  ;;  %805 = vmatpush1.msra.mxu0 %v774_v13 }
  0xb8   : > { %v741_v14 = vsel %vm350_vm4, %v737_v8, %v1216_v10 }
  0xb9   : > { %1154 = vmatprep.subr.msk.mxu0 %vm1456_vm5, %v741_v14  ;;  %v735_v15 = vpop.permute.xlu1 %734 }
  0xba   : > { %v740_v16 = vsel %vm350_vm4, %v735_v15, %v737_v8 }
  0xbb   : > { %v725_v12 = vpop.permute.xlu0 %724  ;;  %1155 = vmatpush1.msk.msra.mxu0 %vm1460_vm7, %v740_v16 }
  0xbd   : > { %v727_v20 = vpop.permute.xlu1 %726 }
  0xbe   : > { %v729_v21 = vsel %vm337_vm6, %v725_v12, %v727_v20 }
  0xbf   : > { %v723_v18 = vpop.permute.xlu0 %722  ;;  %1156 = vmatprep.subr.msk.mxu0 %vm1435_vm1, %v729_v21 }
  0xc0   : > { %v728_v22 = vsel %vm337_vm6, %v723_v18, %v725_v12 }
  0xc1   : > { %1157 = vmatpush1.msk.msra.mxu0 %vm1439_vm2, %v728_v22  ;;  %v707_v24 = vpop.permute.xlu1 %706 }
  0xc2   : > { %810 = vmatprep.subr.mxu0 %v1353_v3 }
  0xc3   : > { %v709_v23 = vpop.permute.xlu0 %708  ;;  %811 = vmatpush1.msra.mxu0 %v1362_v4 }
  0xc4   : > { %v711_v25 = vsel %vm318_vm8, %v707_v24, %v709_v23 }
  0xc5   : > { %1158 = vmatprep.subr.msk.mxu0 %vm1456_vm5, %v711_v25  ;;  %v705_v27 = vpop.permute.xlu1 %704 }
  0xc6   : > { %v710_v28 = vsel %vm318_vm8, %v705_v27, %v707_v24 }
  0xc7   : > { %v695_v26 = vpop.permute.xlu0 %694  ;;  %1159 = vmatpush1.msk.msra.mxu0 %vm1460_vm7, %v710_v28 }
  0xc9   : > { %v697_v31 = vpop.permute.xlu1 %696 }
  0xca   : > { %v699_v33 = vsel %vm305_vm9, %v695_v26, %v697_v31 }
  0xcb   : > { %v693_v29 = vpop.permute.xlu0 %692  ;;  %1160 = vmatprep.subr.msk.mxu0 %vm1435_vm1, %v699_v33 }
  0xcc   : > { %v698_v34 = vsel %vm305_vm9, %v693_v29, %v695_v26 }
  0xcd   : > { %1161 = vmatpush1.msk.msra.mxu0 %vm1439_vm2, %v698_v34  ;;  %v761_v36 = vpop.permute.xlu1 %760 }
  0xcf   : > { %v763_v35 = vpop.permute.xlu0 %762 }
  0xd0   : > { %v765_v37 = vsel %vm376_vm10, %v761_v36, %v763_v35 }
  0xd1   : > { %816 = vmatprep.subr.mxu0 %v765_v37  ;;  %v759_v39 = vpop.permute.xlu1 %758 }
  0xd2   : > { %v764_v40 = vsel %vm376_vm10, %v759_v39, %v761_v36 }
  0xd3   : > { %v683_v38 = vpop.permute.xlu0 %682  ;;  %817 = vmatpush1.msra.mxu0 %v764_v40 }
  0xd5   : > { %v685_v42 = vpop.permute.xlu1 %684 }
  0xd6   : > { %v687_v43 = vsel %vm288_vm11, %v683_v38, %v685_v42 }
  0xd7   : > { %v681_v41 = vpop.permute.xlu0 %680  ;;  %1162 = vmatprep.subr.msk.mxu0 %vm1456_vm5, %v687_v43 }
  0xd8   : > { %v686_v44 = vsel %vm288_vm11, %v681_v41, %v683_v38 }
  0xd9   : > { %1163 = vmatpush1.msk.msra.mxu0 %vm1460_vm7, %v686_v44 }
  0xda   : > { %1164 = vmatmul.mubr.msk.f32.vlgmr.msra.gmra.mxu0 %vm399_vm12, %v392_v60 }
  0xe2   : > { %v397_v45 = vpop.permute.xlu1 %396 }
  0xe4   : > { %v783_v52 = vpop.permute.xlu0 %782 }
  0xe6   : > { %v1622_v60 = vpop.permute.xlu1 %1220 }
  0xe7   : > { %v1222_v23 = vunpack.i.l.bf16 %v1622_v60 }
  0xe8   : > { %v1630_v62 = vpop.permute.xlu0 %1225 }
  0xe9   : > { %v1227_v27 = vunpack.i.l.bf16 %v1630_v62 }
  0xea   : > { %v1628_v61 = vpop.permute.xlu1 %1230 }
  0xeb   : > { %v1232_v31 = vunpack.i.l.bf16 %v1628_v61 }
  0xec   : > { %v531_v5 = vpop.permute.xlu0 %530 }
  0xee   : > { %v497_v63 = vpop.permute.xlu1 %496 }
  0xf0   : > { %v509_v7 = vpop.permute.xlu0 %508 }
  0xf2   : > { %v485_v6 = vpop.permute.xlu1 %484 }
  0xf4   : > { %v563_v9 = vpop.permute.xlu0 %562 }
  0xf6   : > { %v1632_v8 = vpop.permute.xlu1 %915 }
  0xf8   : > { %v1636_v11 = vpop.permute.xlu0 %881 }
  0xfa   : > { %v1634_v10 = vpop.permute.xlu1 %893 }
  0xfe   : > { %v1638_v13 = vpop.permute.xlu1 %947 }
 0x170   : > { %v469_v46 = vpop.f32.mrf.mxu0 }
 0x171   : > { %v470_v47 = vadd.f32 %v469_v46, %v397_v45 }
 0x172   : > { %v471_v49 = vpop.f32.mrf.mxu0 }
 0x173   : > { %v1549_v48 = vmax.f32 %v470_v47, 0.0  ;;  %v472_v50 = vadd.f32 %v471_v49, %v397_v45 }
 0x175   : > { %572 = vrot.lane.b32.xlu1 %v1549_v48, %s1244_s23  ;;  %550 = vrot.lane.b32.xlu0 %v1549_v48, %s1243_s21  ;;  %v1567_v51 = vmax.f32 %v472_v50, 0.0 }
 0x179   : > { %526 = vrot.lane.b32.xlu1 %v1549_v48, %s1246_s28  ;;  %538 = vrot.lane.b32.xlu0 %v1549_v48, %s1245_s27 }
 0x17d   : > { %498 = vrot.lane.b32.xlu1 %v1549_v48, %s1248_s30  ;;  %510 = vrot.lane.b32.xlu0 %v1549_v48, %s1247_s29 }
 0x181   : > { %486 = vrot.lane.b32.xlu1 %v1549_v48, %s1250_s7  ;;  %564 = vrot.lane.b32.xlu0 %v1549_v48, %s1249_s6 }
 0x185   : > { %552 = vrot.lane.b32.xlu1 %v1567_v51, %s1243_s21  ;;  %540 = vrot.lane.b32.xlu0 %v1567_v51, %s1245_s27 }
 0x189   : > { %574 = vrot.lane.b32.xlu1 %v1567_v51, %s1244_s23  ;;  %500 = vrot.lane.b32.xlu0 %v1567_v51, %s1248_s30 }
 0x18d   : > { %528 = vrot.lane.b32.xlu1 %v1567_v51, %s1246_s28  ;;  %488 = vrot.lane.b32.xlu0 %v1567_v51, %s1250_s7 }
 0x191   : > { %512 = vrot.lane.b32.xlu1 %v1567_v51, %s1247_s29 }
 0x195   : > { %566 = vrot.lane.b32.xlu1 %v1567_v51, %s1249_s6 }
 0x19a   : > { %v854_v53 = vpop.f32.mrf.mxu0 }
 0x19b   : > { %v855_v54 = vadd.f32 %v854_v53, %v783_v52 }
 0x19c   : > { %v856_v56 = vpop.f32.mrf.mxu0 }
 0x19d   : > { %v1585_v55 = vmax.f32 %v855_v54, 0.0  ;;  %v857_v57 = vadd.f32 %v856_v56, %v783_v52 }
 0x19f   : > { %935 = vrot.lane.b32.xlu1 %v1585_v55, %s1243_s21  ;;  %911 = vrot.lane.b32.xlu0 %v1585_v55, %s1246_s28  ;;  %v1599_v58 = vmax.f32 %v857_v57, 0.0 }
 0x1a3   : > { %957 = vrot.lane.b32.xlu1 %v1585_v55, %s1244_s23  ;;  %883 = vrot.lane.b32.xlu0 %v1585_v55, %s1248_s30 }
 0x1a7   : > { %923 = vrot.lane.b32.xlu1 %v1585_v55, %s1245_s27  ;;  %871 = vrot.lane.b32.xlu0 %v1585_v55, %s1250_s7 }
 0x1ab   : > { %895 = vrot.lane.b32.xlu1 %v1585_v55, %s1247_s29  ;;  %937 = vrot.lane.b32.xlu0 %v1599_v58, %s1243_s21 }
 0x1af   : > { %949 = vrot.lane.b32.xlu1 %v1585_v55, %s1249_s6  ;;  %959 = vrot.lane.b32.xlu0 %v1599_v58, %s1244_s23 }
 0x1b3   : > { %885 = vrot.lane.b32.xlu1 %v1599_v58, %s1248_s30  ;;  %925 = vrot.lane.b32.xlu0 %v1599_v58, %s1245_s27 }
 0x1b7   : > { %873 = vrot.lane.b32.xlu1 %v1599_v58, %s1250_s7  ;;  %913 = vrot.lane.b32.xlu0 %v1599_v58, %s1246_s28 }
 0x1bb   : > { %586 = vperm.xlu1 %1217, %v583_v59   ;;  %897 = vrot.lane.b32.xlu0 %v1599_v58, %s1247_s29 }
 0x1bf   : > { %951 = vrot.lane.b32.xlu0 %v1599_v58, %s1249_s6 }
 0x1c3   : > { %869 = vrot.lane.b32.xlu0 %v1242_v0, %s1250_s7 }
 0x1c7   : > { %971 = vperm.xlu0 %1218, %v583_v59  }
 0x1e7   : > { %v573_v14 = vpop.permute.xlu1 %572  ;;  %v551_v12 = vpop.permute.xlu0 %550 }
 0x1eb   : > { %v527_v15 = vpop.permute.xlu1 %526  ;;  %v539_v16 = vpop.permute.xlu0 %538 }
 0x1ef   : > { %v499_v18 = vpop.permute.xlu1 %498  ;;  %v511_v20 = vpop.permute.xlu0 %510 }
 0x1f0   : > { %v514_v43 = vsel %vm318_vm8, %v509_v7, %v511_v20  ;;  %v502_v45 = vsel %vm305_vm9, %v497_v63, %v499_v18 }
 0x1f3   : > { %v487_v21 = vpop.permute.xlu1 %486  ;;  %v565_v22 = vpop.permute.xlu0 %564 }
 0x1f4   : > { %v568_v49 = vsel %vm376_vm10, %v563_v9, %v565_v22  ;;  %v490_v52 = vsel %vm288_vm11, %v485_v6, %v487_v21 }
 0x1f7   : > { %v553_v24 = vpop.permute.xlu1 %552  ;;  %v541_v28 = vpop.permute.xlu0 %540 }
 0x1f8   : > { %v557_v25 = vsel %vm363_vm0, %v553_v24, %v1222_v23  ;;  %v556_v26 = vsel %vm363_vm0, %v551_v12, %v553_v24  ;;  %v545_v35 = vsel %vm350_vm4, %v541_v28, %v1232_v31  ;;  %v544_v36 = vsel %vm350_vm4, %v539_v16, %v541_v28 }
 0x1f9   : > { %1137 = vmatprep.subr.msk.mxu1 %vm1435_vm1, %v557_v25  ;;  %v1228_v12 = vunpack.i.h.bf16 %v1630_v62 }
 0x1fa   : > { %1138 = vmatpush1.msk.msra.mxu1 %vm1439_vm2, %v556_v26 }
 0x1fb   : > { %v575_v29 = vpop.permute.xlu1 %574  ;;  %v501_v40 = vpop.permute.xlu0 %500 }
 0x1fc   : > { %v579_v33 = vsel %vm387_vm3, %v575_v29, %v1227_v27  ;;  %v578_v34 = vsel %vm387_vm3, %v573_v14, %v575_v29  ;;  %v503_v44 = vsel %vm305_vm9, %v499_v18, %v501_v40 }
 0x1fd   : > { %608 = vmatprep.subr.mxu1 %v579_v33 }
 0x1fe   : > { %609 = vmatpush1.msra.mxu1 %v578_v34 }
 0x1ff   : > { %v529_v37 = vpop.permute.xlu1 %528  ;;  %1139 = vmatprep.subr.msk.mxu1 %vm1456_vm5, %v545_v35  ;;  %v489_v46 = vpop.permute.xlu0 %488 }
 0x200   : > { %v532_v38 = vsel %vm337_vm6, %v527_v15, %v529_v37  ;;  %v533_v39 = vsel %vm337_vm6, %v529_v37, %v531_v5  ;;  %1140 = vmatpush1.msk.msra.mxu1 %vm1460_vm7, %v544_v36  ;;  %v491_v50 = vsel %vm288_vm11, %v487_v21, %v489_v46  ;;  %v1223_v5 = vunpack.i.h.bf16 %v1622_v60 }
 0x201   : > { %1141 = vmatprep.subr.msk.mxu1 %vm1435_vm1, %v533_v39  ;;  %v1233_v60 = vunpack.i.h.bf16 %v1628_v61 }
 0x202   : > { %1142 = vmatpush1.msk.msra.mxu1 %vm1439_vm2, %v532_v38 }
 0x203   : > { %v513_v41 = vpop.permute.xlu1 %512  ;;  %614 = vmatprep.subr.mxu1 %v1567_v51  ;;  %v582_v51 = vld [vmem:[%s1754_s2] sm:$0xff] }
 0x204   : > { %v515_v42 = vsel %vm318_vm8, %v511_v20, %v513_v41  ;;  %615 = vmatpush1.msra.mxu1 %v1549_v48 }
 0x205   : > { %1143 = vmatprep.subr.msk.mxu1 %vm1456_vm5, %v515_v42 }
 0x206   : > { %1144 = vmatpush1.msk.msra.mxu1 %vm1460_vm7, %v514_v43 }
 0x207   : > { %v567_v47 = vpop.permute.xlu1 %566  ;;  %1145 = vmatprep.subr.msk.mxu1 %vm1435_vm1, %v503_v44 }
 0x208   : > { %1146 = vmatpush1.msk.msra.mxu1 %vm1439_vm2, %v502_v45  ;;  %v569_v48 = vsel %vm376_vm10, %v565_v22, %v567_v47 }
 0x209   : > { %620 = vmatprep.subr.mxu1 %v569_v48 }
 0x20a   : > { %621 = vmatpush1.msra.mxu1 %v568_v49 }
 0x20b   : > { %1147 = vmatprep.subr.msk.mxu1 %vm1456_vm5, %v491_v50 }
 0x20c   : > { %1148 = vmatpush1.msk.msra.mxu1 %vm1460_vm7, %v490_v52 }
 0x20d   : > { %1149 = vmatmul.mubr.msk.f32.vlgmr.msra.gmra.mxu1 %vm399_vm12, %v582_v51 }
 0x20e   : > { %1041 = vmatprep.mubr.f32.mxu1 %v1242_v0 }
 0x211   : > { %v936_v53 = vpop.permute.xlu1 %935  ;;  %v912_v54 = vpop.permute.xlu0 %911 }
 0x215   : > { %v958_v56 = vpop.permute.xlu1 %957  ;;  %v884_v57 = vpop.permute.xlu0 %883 }
 0x216   : > { %v887_v28 = vsel %vm305_vm9, %v1636_v11, %v884_v57 }
 0x219   : > { %v924_v59 = vpop.permute.xlu1 %923  ;;  %v872_v63 = vpop.permute.xlu0 %871 }
 0x21d   : > { %v938_v7 = vpop.permute.xlu0 %937  ;;  %v896_v14 = vpop.permute.xlu1 %895 }
 0x21e   : > { %v941_v6 = vsel %vm363_vm0, %v936_v53, %v938_v7  ;;  %v942_v9 = vsel %vm363_vm0, %v938_v7, %v1223_v5  ;;  %v899_v27 = vsel %vm318_vm8, %v1634_v10, %v896_v14 }
 0x21f   : > { %1165 = vmatprep.subr.msk.mxu1 %vm1435_vm1, %v942_v9 }
 0x220   : > { %1166 = vmatpush1.msk.msra.mxu1 %vm1439_vm2, %v941_v6 }
 0x221   : > { %v960_v0 = vpop.permute.xlu0 %959  ;;  %v950_v18 = vpop.permute.xlu1 %949 }
 0x222   : > { %v963_v15 = vsel %vm387_vm3, %v958_v56, %v960_v0  ;;  %v964_v16 = vsel %vm387_vm3, %v960_v0, %v1228_v12  ;;  %v953_v10 = vsel %vm376_vm10, %v1638_v13, %v950_v18 }
 0x223   : > { %993 = vmatprep.subr.mxu1 %v964_v16 }
 0x224   : > { %994 = vmatpush1.msra.mxu1 %v963_v15 }
 0x225   : > { %v926_v20 = vpop.permute.xlu0 %925  ;;  %v886_v61 = vpop.permute.xlu1 %885 }
 0x226   : > { %v929_v21 = vsel %vm350_vm4, %v924_v59, %v926_v20  ;;  %v930_v22 = vsel %vm350_vm4, %v926_v20, %v1233_v60 }
 0x227   : > { %1167 = vmatprep.subr.msk.mxu1 %vm1456_vm5, %v930_v22 }
 0x228   : > { %1168 = vmatpush1.msk.msra.mxu1 %vm1460_vm7, %v929_v21 }
 0x229   : > { %v914_v62 = vpop.permute.xlu0 %913 }
 0x22a   : > { %v917_v23 = vsel %vm337_vm6, %v912_v54, %v914_v62  ;;  %v918_v24 = vsel %vm337_vm6, %v914_v62, %v1632_v8  ;;  %v888_v8 = vsel %vm305_vm9, %v884_v57, %v886_v61 }
 0x22b   : > { %1169 = vmatprep.subr.msk.mxu1 %vm1435_vm1, %v918_v24 }
 0x22c   : > { %1170 = vmatpush1.msk.msra.mxu1 %vm1439_vm2, %v917_v23 }
 0x22d   : > { %999 = vmatprep.subr.mxu1 %v1599_v58  ;;  %v898_v25 = vpop.permute.xlu0 %897  ;;  %v874_v58 = vpop.permute.xlu1 %873 }
 0x22e   : > { %v900_v26 = vsel %vm318_vm8, %v896_v14, %v898_v25  ;;  %1000 = vmatpush1.msra.mxu1 %v1585_v55  ;;  %v876_v31 = vsel %vm288_vm11, %v872_v63, %v874_v58 }
 0x22f   : > { %1171 = vmatprep.subr.msk.mxu1 %vm1456_vm5, %v900_v26 }
 0x230   : > { %1172 = vmatpush1.msk.msra.mxu1 %vm1460_vm7, %v899_v27 }
 0x231   : > { %1173 = vmatprep.subr.msk.mxu1 %vm1435_vm1, %v888_v8  ;;  %v952_v29 = vpop.permute.xlu0 %951 }
 0x232   : > { %1174 = vmatpush1.msk.msra.mxu1 %vm1439_vm2, %v887_v28  ;;  %v954_v55 = vsel %vm376_vm10, %v950_v18, %v952_v29 }
 0x233   : > { %1005 = vmatprep.subr.mxu1 %v954_v55 }
 0x234   : > { %1006 = vmatpush1.msra.mxu1 %v953_v10 }
 0x235   : > { %1175 = vmatprep.subr.msk.mxu1 %vm1456_vm5, %v876_v31  ;;  %v870_v11 = vpop.permute.xlu0 %869 }
 0x236   : > { %v875_v17 = vsel %vm288_vm11, %v870_v11, %v872_v63  ;;  %v587_v19 = vpop.permute.xlu1 %586 }
 0x237   : > { %1176 = vmatpush1.msk.msra.mxu1 %vm1460_vm7, %v875_v17 }
 0x238   : > { %1177 = vmatmul.mubr.msk.f32.vlgmr.msra.gmra.mxu1 %vm399_vm12, %v582_v51 }
 0x242   : > { %v972_v38 = vpop.permute.xlu0 %971 }
 0x2cd   : > { %v658_v33 = vpop.f32.mrf.mxu1 }
 0x2ce   : > { %v659_v34 = vadd.f32 %v658_v33, %v587_v19 }
 0x2cf   : > { %v660_v35 = vpop.f32.mrf.mxu1 }
 0x2d0   : > { %v663_v13 = vadd.f32 %v659_v34, %v1307_v1  ;;  %v661_v36 = vadd.f32 %v660_v35, %v587_v19 }
 0x2d2   : > { %v665_v30 = vmax.f32 %v663_v13, 0.0  ;;  %v664_v37 = vadd.f32 %v661_v36, %v1310_v2 }
 0x2d4   : > { %667 = vst [vmem:[%s231_s19] sm:$0xff] %v665_v30  ;;  %v666_v32 = vmax.f32 %v664_v37, 0.0 }
 0x2d6   : > { %668 = vst [vmem:[%s231_s19 + $0x8] sm:$0xff] %v666_v32 }
 0x2f8   : > { %v1043_v39 = vpop.f32.mrf.mxu1 }
 0x2f9   : > { %v1044_v40 = vadd.f32 %v1043_v39, %v972_v38 }
 0x2fa   : > { %v1045_v41 = vpop.f32.mrf.mxu1 }
 0x2fb   : > { %v1048_v42 = vadd.f32 %v1362_v4, %v1044_v40  ;;  %v1046_v43 = vadd.f32 %v1045_v41, %v972_v38 }
 0x2fd   : > { %v1050_v1 = vmax.f32 %v1048_v42, 0.0  ;;  %v1049_v44 = vadd.f32 %v1353_v3, %v1046_v43 }
 0x2ff   : > { %1178 = vst [vmem:[%s231_s19 + $0x10] sm:$0xff] %v1050_v1  ;;  %v1051_v45 = vmax.f32 %v1049_v44, 0.0 }
 0x301   : > { %1179 = vst [vmem:[%s231_s19 + $0x18] sm:$0xff] %v1051_v45 }
 0x302 PF: > { %s15_s18 = sadd.s32 1, %s1240_s18  }
 0x303   : > { %p12_p4 = scmp.ge.s32.totalorder %s15_s18, 6  }
 0x305   :  { %14 = sbr.rel (!%p12_p4) target bundleno = 1 (0x1), region = 72 }

</bundles_post_ra>
